<compile_context>
chip_gen: v7x
topology: tpu7x:2x2x1
jax: 0.10.0
libtpu: 0.0.40
codegen_flags: <defaults>
</compile_context>

<pallas_src>
import jax
import jax.numpy as jnp
from jax.experimental import pallas as pl
from jax.experimental.pallas import tpu as pltpu

_LANES = 128
_SUBLANES = 8
_PALLAS_MIN_BATCH = 256  # below this, pallas_call fixed cost dominates


def fused_mlp_kernel(x_ref, w_ref, b_ref, o_ref):
    # x_ref: (tile, D_in)  w_ref: (D_in, 128)  b_ref: (1, D_out)  o_ref: (tile, D_out)
    acc = jnp.dot(x_ref[...], w_ref[...], preferred_element_type=jnp.float32)
    d_out = o_ref.shape[-1]
    o_ref[...] = (acc[:, :d_out] + b_ref[...]).astype(o_ref.dtype)


def _round_up(v, m):
    return ((v + m - 1) // m) * m


def _fuse_affine(params):
    w_f = params["w1"] @ params["w2"] @ params["w3"]                            # [D_in, D_out]
    b_f = (params["b1"] @ params["w2"] + params["b2"]) @ params["w3"] + params["b3"]
    return w_f, b_f


def mlp_forward(x, params, *, batch_tile=1024, force_pallas=False):
    """x: [B, input_dims] float32.  params: dict of w1,b1,w2,b2,w3,b3
    (weights stored [in_features, out_features])."""
    B, D_in = x.shape
    D_out = params["w3"].shape[1]  # 2

    w_f, b_f = _fuse_affine(params)

    if not force_pallas and B < _PALLAS_MIN_BATCH:
        # Tiny batch: a single fused XLA matmul beats the pallas_call fixed cost.
        return (x @ w_f + b_f).astype(x.dtype)

    # Batch tile: large (amortize ~0.35us/step) but keep >= 2 grid steps when
    # possible so the "parallel" axis can be sharded across both v7x TCs.
    tile = min(batch_tile, _round_up(max(pl.cdiv(B, 2), 1), _SUBLANES))
    tile = max(tile, _SUBLANES)
    grid = (pl.cdiv(B, tile),)

    # Tiny fused weight padded to a full 128-lane slab (VMEM-resident; the
    # compiler pads the VMEM layout to 128 lanes anyway, this just keeps the
    # MXU path on the well-trodden full-width shape).  Bias stays natural.
    n_pad = _round_up(D_out, _LANES)
    w_p = jnp.zeros((D_in, n_pad), jnp.float32).at[:, :D_out].set(w_f)
    bias = b_f.reshape(1, D_out).astype(jnp.float32)

    out = pl.pallas_call(
        fused_mlp_kernel,
        out_shape=jax.ShapeDtypeStruct((B, D_out), jnp.float32),
        grid_spec=pltpu.PrefetchScalarGridSpec(
            num_scalar_prefetch=0,
            grid=grid,
            in_specs=[
                pl.BlockSpec((tile, D_in), lambda i: (i, 0)),    # x streams, unpadded
                pl.BlockSpec((D_in, n_pad), lambda i: (0, 0)),   # fused W, resident
                pl.BlockSpec((1, D_out), lambda i: (0, 0)),      # fused bias, resident
            ],
            out_specs=pl.BlockSpec((tile, D_out), lambda i: (i, 0)),
        ),
        compiler_params=pltpu.CompilerParams(
            dimension_semantics=("parallel",)),
    )(x.astype(jnp.float32), w_p, bias)

    return out.astype(x.dtype)


def init_params(key, input_dims):
    """Deterministic init mimicking PyTorch nn.Linear default
    (U[-1/sqrt(fan_in), 1/sqrt(fan_in)]); weights stored [in, out]."""
    dims = [(input_dims, 16), (16, 16), (16, 2)]
    params = {}
    for idx, (fan_in, fan_out) in enumerate(dims, start=1):
        key, kw, kb = jax.random.split(key, 3)
        bound = 1.0 / jnp.sqrt(jnp.float32(fan_in))
        params[f"w{idx}"] = jax.random.uniform(
            kw, (fan_in, fan_out), jnp.float32, -bound, bound)
        params[f"b{idx}"] = jax.random.uniform(
            kb, (fan_out,), jnp.float32, -bound, bound)
    return params


def mlp_reference(x, params):
    # Layer-by-layer reference (matches the PyTorch forward exactly).
    h = x @ params["w1"] + params["b1"]
    h = h @ params["w2"] + params["b2"]
    h = h @ params["w3"] + params["b3"]
    return h


if __name__ == "__main__":
    key = jax.random.PRNGKey(0)
    input_dims = 32
    batch = 8

    kx, kp = jax.random.split(key)
    x = jax.random.normal(kx, (batch, input_dims), jnp.float32)
    params = init_params(kp, input_dims)

    # Small shape: force the Pallas path so the kernel itself runs here.
    out = jax.block_until_ready(mlp_forward(x, params, force_pallas=True))
    ref = mlp_reference(x, params)
    assert out.shape == (batch, 2)
    # Weight fusion changes FP associativity slightly; 1e-5 tolerance is ample.
    assert jnp.allclose(out, ref, atol=1e-5, rtol=1e-5)

    # Auto-dispatch for tiny batches: plain fused XLA matmul path.
    out_xla = jax.block_until_ready(mlp_forward(x, params))
    assert jnp.allclose(out_xla, ref, atol=1e-5, rtol=1e-5)

    # Large batch: 2-step grid of 1024-row tiles, unpadded streaming.
    big_b = 2048
    xb = jax.random.normal(kx, (big_b, input_dims), jnp.float32)
    out_b = jax.block_until_ready(mlp_forward(xb, params))
    assert out_b.shape == (big_b, 2)
    assert jnp.allclose(out_b, mlp_reference(xb, params), atol=1e-5, rtol=1e-5)

    # Ragged batch: partial final block (OOB rows masked on writeback).
    rag_b = 520
    xr = jax.random.normal(kx, (rag_b, input_dims), jnp.float32)
    out_r = jax.block_until_ready(mlp_forward(xr, params))
    assert out_r.shape == (rag_b, 2)
    assert jnp.allclose(out_r, mlp_reference(xr, params), atol=1e-5, rtol=1e-5)

    print("KERNEL_OK")
</pallas_src>

<mosaic_0001>
module attributes {stable_mosaic.version = 11 : i64} {
  func.func @fused_mlp_kernel(%arg0: i32, %arg1: memref<8x32xf32, #tpu.memory_space<vmem>>, %arg2: memref<32x128xf32, #tpu.memory_space<vmem>>, %arg3: memref<1x2xf32, #tpu.memory_space<vmem>>, %arg4: memref<8x2xf32, #tpu.memory_space<vmem>>) attributes {dimension_semantics = [#tpu.dimension_semantics<parallel>], iteration_bounds = array<i64: 1>, scalar_prefetch = 0 : i64, scratch_operands = 0 : i64, tpu.core_type = #tpu.core_type<tc>, window_params = [{transform_indices = @transform_0, window_bounds = array<i64: 8, 32>}, {pipeline_mode = #tpu.pipeline_mode<synchronous>, transform_indices = @transform_1, window_bounds = array<i64: 32, 128>}, {pipeline_mode = #tpu.pipeline_mode<synchronous>, transform_indices = @transform_2, window_bounds = array<i64: 1, 2>}, {transform_indices = @transform_3, window_bounds = array<i64: 8, 2>}]} {
    %c0 = arith.constant 0 : index
    %c0_0 = arith.constant 0 : index
    %0 = vector.load %arg1[%c0, %c0_0] : memref<8x32xf32, #tpu.memory_space<vmem>>, vector<8x32xf32>
    %c0_1 = arith.constant 0 : index
    %c0_2 = arith.constant 0 : index
    %1 = vector.load %arg2[%c0_1, %c0_2] : memref<32x128xf32, #tpu.memory_space<vmem>>, vector<32x128xf32>
    %cst = arith.constant dense<0.000000e+00> : vector<8x128xf32>
    %2 = tpu.matmul %0, %1, %cst {dimension_numbers = #tpu.dot_dimension_numbers<[1], [0], [0], [1], [0, 0, 1, 1], [], []>} : vector<8x32xf32>, vector<32x128xf32>, vector<8x128xf32> -> vector<8x128xf32>
    %3 = vector.extract_strided_slice %2 {offsets = [0, 0], sizes = [8, 2], strides = [1, 1]} : vector<8x128xf32> to vector<8x2xf32>
    %c0_3 = arith.constant 0 : index
    %c0_4 = arith.constant 0 : index
    %4 = vector.load %arg3[%c0_3, %c0_4] : memref<1x2xf32, #tpu.memory_space<vmem>>, vector<1x2xf32>
    %5 = vector.broadcast %4 : vector<1x2xf32> to vector<8x2xf32>
    %6 = arith.addf %3, %5 : vector<8x2xf32>
    %c0_5 = arith.constant 0 : index
    %c0_6 = arith.constant 0 : index
    %7 = vector.load %arg4[%c0_5, %c0_6] : memref<8x2xf32, #tpu.memory_space<vmem>>, vector<8x2xf32>
    tpu.vector_store %arg4[%c0_5, %c0_6], %6 {strides = array<i32>} : memref<8x2xf32, #tpu.memory_space<vmem>>, vector<8x2xf32>,
    return
  }
  func.func @transform_0(%arg0: i32) -> (i32, i32) {
    %c0_i32 = arith.constant 0 : i32
    %c0_i32_0 = arith.constant 0 : i32
    return %arg0, %c0_i32 : i32, i32
  }
  func.func @transform_1(%arg0: i32) -> (i32, i32) {
    %c0_i32 = arith.constant 0 : i32
    %c0_i32_0 = arith.constant 0 : i32
    %c0_i32_1 = arith.constant 0 : i32
    return %c0_i32, %c0_i32_0 : i32, i32
  }
  func.func @transform_2(%arg0: i32) -> (i32, i32) {
    %c0_i32 = arith.constant 0 : i32
    %c0_i32_0 = arith.constant 0 : i32
    %c0_i32_1 = arith.constant 0 : i32
    return %c0_i32, %c0_i32_0 : i32, i32
  }
  func.func @transform_3(%arg0: i32) -> (i32, i32) {
    %c0_i32 = arith.constant 0 : i32
    %c0_i32_0 = arith.constant 0 : i32
    return %arg0, %c0_i32 : i32, i32
  }
}

</mosaic_0001>

<bundles_post_ra>
// kernel: tpu_custom_call.1
= control target key start
LH: loop header
LB: loop body
LE: loop exit
PB: predicated region body
PF: predicated region fallthrough
CT: control target
= control target key end

     0   :  { %8 = vsyncpa [#allocation3], 0  ;;  %s278_s0 = inlined_call_operand.hbm [shape: f32[8,32], index: 0, kind: input, shape index: {}]   ;;  %s279_s1 = inlined_call_operand.hbm [shape: f32[32,128], index: 1, kind: input, shape index: {}]   ;;  %s280_s2 = inlined_call_operand.vmem [shape: f32[1,2], index: 2, kind: input, shape index: {}]   ;;  %s281_s3 = inlined_call_operand.vmem [shape: f32[8,2], index: 3, kind: output, shape index: {}]  }
   0x1   :  { %9 = vsyncpa [#allocation5], 0  ;;  %s214_s12 = smov [#allocation2]   ;;  %s215_s14 = smov [#allocation4]  }
   0x2   :  { %s16_s13 = sshll.u32 %s214_s12, 4  ;;  %s25_s15 = sshll.u32 %s215_s14, 4  ;;  %s17_s13 = int_to_ptr.vmem [resolvable:$true] %s16_s13  ;;  %s241_s15 = int_to_ptr.vmem [resolvable:$true] %s25_s15 }
   0x3   :  { %s166_s18 = scalar_lea.hbm %s278_s0, 128 }
   0x4   :  { %p167_p0 = scmp.ne.s32.totalorder %s278_s0, %s166_s18  ;;  %p170_p1 = scmp.lt.u32.totalorder %s166_s18, %s278_s0 }
   0x6   :  { %p172_p2 = pnand %p170_p1, %p167_p0 }
   0x8   :  { %175 = shalt.err (!%p172_p2)
}
   0x9   :  { %s176_s23 = scalar_lea.vmem %s17_s13, 128  ;;  %p181_p4 = scmp.lt.s32.totalorder %s17_s13, %s17_s13 }
   0xa   :  { %p177_p3 = scmp.ne.s32.totalorder %s17_s13, %s176_s23  ;;  %p182_p5 = scmp.lt.s32.totalorder %s176_s23, %s176_s23 }
   0xc   :  { %p183_p6 = por %p182_p5, %p181_p4 }
   0xe   :  { %p184_p7 = pnand %p183_p6, %p177_p3 }
  0x10   :  { %187 = shalt.err (!%p184_p7)
}
  0x11   :  { %19 = dma.hbm_to_vmem [thread:$0]  %s278_s0, 128, %s17_s13, [#allocation3]  }
  0x12   :  { %s188_s28 = scalar_lea.hbm %s279_s1, 512 }
  0x13   :  { %p189_p8 = scmp.ne.s32.totalorder %s279_s1, %s188_s28  ;;  %p192_p9 = scmp.lt.u32.totalorder %s188_s28, %s279_s1 }
  0x15   :  { %p194_p10 = pnand %p192_p9, %p189_p8 }
  0x17   :  { %197 = shalt.err (!%p194_p10)
}
  0x18   :  { %s198_s6 = scalar_lea.vmem %s241_s15, 512  ;;  %p203_p12 = scmp.lt.s32.totalorder %s241_s15, %s241_s15 }
  0x19   :  { %p199_p11 = scmp.ne.s32.totalorder %s241_s15, %s198_s6  ;;  %p204_p13 = scmp.lt.s32.totalorder %s198_s6, %s198_s6 }
  0x1b   :  { %p205_p0 = por %p204_p13, %p203_p12 }
  0x1d   :  { %p206_p1 = pnand %p205_p0, %p199_p11 }
  0x1f   :  { %209 = shalt.err (!%p206_p1)
}
  0x20   :  { %s216_s0 = smov 128   ;;  %s217_s7 = smov 8  }
  0x21   :  { %31 = dma.hbm_to_vmem [thread:$0]  %s279_s1, 512, %s241_s15, [#allocation5], %s216_s0, %s216_s0, %s217_s7  }
  0x22   :  { %210 = dma.done.wait [#allocation3], 128  }
  0x23   :  { %211 = vsyncadd [#allocation3], 4294967168 }
  0x24   :  { %212 = dma.done.wait [#allocation5], 512  }
  0x25   :  { %213 = vsyncadd [#allocation5], 4294966784  ;;  %v218_v0 = vmov 0.0|0.0   ;;  %vm219_vm0 = vmmov 0   ;;  %v220_v1 = vmov 0.0   ;;  %v41_v2 = vld [vmem:[#allocation4] sm:$0xff] }
  0x26   :  { %153 = vmatprep.subr.bf16.mxu0 %v218_v0  ;;  %150 = vmatprep.mubr.msk.f32.mxu0 %vm219_vm0, %v220_v1  ;;  %v42_v3 = vld [vmem:[#allocation4 + $0x8] sm:$0xff]  ;;  %v43_v4 = vld [vmem:[#allocation4 + $0x10] sm:$0xff]  ;;  %v44_v6 = vld [vmem:[#allocation4 + $0x18] sm:$0xff]  ;;  %vm45_vm1 = vcmask 261120   ;;  %vm127_vm2 = vcmask 15360  }
  0x27   :  { %v154_v5 = vpack.c.bf16 %v42_v3, %v41_v2  ;;  %v157_v7 = vpack.c.bf16 %v44_v6, %v43_v4  ;;  %v40_v8 = vld [vmem:[#allocation2] sm:$0xff]  ;;  %v136_v9 = vld [vmem:[%s280_s2] ss:$0 sm:$0xff] }
  0x29   :  { %155 = vmatpush3.bf16.msra.mxu0 %v154_v5 }
  0x2a   :  { %156 = vmatprep.subr.bf16.mxu0 %v218_v0 }
  0x2d   :  { %158 = vmatpush3.bf16.msra.mxu0 %v157_v7 }
  0x30   :  { %151 = vmatmul.mubr.msk.f32.vlgmr.msra.gmra.mrb[0].mxu0 %vm45_vm1, %v40_v8 }
 0x103   :  { %v115_v10 = vpop.f32.mrb[0].mxu0 }
 0x104   :  { %v126_v11 = vadd.f32 %v136_v9, %v115_v10  ;;  %v152_v12 = vpop.f32.mrb[1].mxu0 }
 0x106   :  { %128 = vst.msk [vmem:[%s281_s3] sm:$0xff] %vm127_vm2, %v126_v11 }
 0x107   :  { %133 = vsyncpa [#allocation3], 1 }
 0x108   :  { %134 = vsyncpa [#allocation5], 1 }

</bundles_post_ra>
